<compile_context>
chip_gen: v7x
topology: tpu7x:2x2x1
jax: 0.10.0
libtpu: 0.0.40
codegen_flags: <defaults>
</compile_context>

<pallas_src>
import jax
import jax.numpy as jnp
from jax.experimental import pallas as pl
from jax.experimental.pallas import tpu as pltpu


def _round_up(x, m):
    return ((x + m - 1) // m) * m


def _fused_mlp_kernel(x_ref, w1_ref, b1_ref, w2_ref, b2_ref, w3_ref, b3_ref, o_ref):
    """Fused 3-layer MLP for one batch tile.

    Matmuls accumulate in f32 on the MXU (preferred_element_type); bias + ReLU run
    in f32 on the VPU. In the bf16 path the hidden activations are cast back to
    bf16 before the next matmul so all three matmuls use the bf16 MXU path.
    """
    # Layer 1: x @ W1 + b1, ReLU.
    h = jnp.dot(x_ref[...], w1_ref[...], preferred_element_type=jnp.float32)
    h = jnp.maximum(h + b1_ref[...], 0.0)
    # Layer 2.
    h = jnp.dot(h.astype(w2_ref.dtype), w2_ref[...], preferred_element_type=jnp.float32)
    h = jnp.maximum(h + b2_ref[...], 0.0)
    # Layer 3 (no ReLU); output written at its TRUE width (narrow masked store is
    # far cheaper than a 32x-padded HBM writeback).
    y = jnp.dot(h.astype(w3_ref.dtype), w3_ref[...], preferred_element_type=jnp.float32)
    o_ref[...] = (y + b3_ref[...]).astype(o_ref.dtype)


def init_feedforward_params(key, input_dim, output_dim, hidden_layers=None):
    """Deterministic init mirroring nn.Linear default (uniform +-1/sqrt(fan_in)).

    Returns a list of (W [in, out], b [out]) in f32, true (unpadded) dims.
    W is stored as [in, out] (transpose of PyTorch's [out, in]) so the kernel
    computes x @ W + b directly.
    """
    if hidden_layers is None:
        hidden_layers = [64, 32]
    dims = [input_dim] + list(hidden_layers) + [output_dim]
    params = []
    for i in range(len(dims) - 1):
        fan_in, fan_out = dims[i], dims[i + 1]
        key, kw, kb = jax.random.split(key, 3)
        bound = 1.0 / jnp.sqrt(jnp.float32(fan_in))
        w = jax.random.uniform(kw, (fan_in, fan_out), jnp.float32, -bound, bound)
        b = jax.random.uniform(kb, (fan_out,), jnp.float32, -bound, bound)
        params.append((w, b))
    return params


def prep_params(params, compute_dtype=jnp.float32):
    """One-time parameter prep: cast weights to the compute dtype (f32 or bf16)
    and reshape biases to [1, out] (kept in f32 for f32 bias+ReLU on the VPU).
    No padding — all shapes stay at their true extents."""
    prepped = []
    for w, b in params:
        prepped.append((w.astype(compute_dtype), b.reshape(1, -1).astype(jnp.float32)))
    return prepped


def feedforward_nn(x, prepped_params, *, tb=4096, min_parallel_tiles=2):
    """Forward pass of the 3-layer MLP as a single fused Pallas kernel.

    x: [B, input_dim]. prepped_params: output of prep_params (3 layers).
    Returns [B, output_dim] in float32.
    """
    assert len(prepped_params) == 3, "fused kernel expects exactly 3 layers"
    (w1, b1), (w2, b2), (w3, b3) = prepped_params

    B, din = x.shape
    assert w1.shape[0] == din
    output_dim = w3.shape[1]

    # Cast activations to the weights' compute dtype (f32 or bf16).
    x = x.astype(w1.dtype)

    # Batch tiling: tile rows derived from cdiv(B, n_tiles) rounded to the 8-row
    # sublane granularity, so batch padding is at most a few rows per tile (never
    # a whole tile). Keep >= 2 parallel grid steps when there is enough work so
    # both v7x TensorCores are used.
    Bp8 = _round_up(B, 8)
    n_tiles = pl.cdiv(Bp8, tb)
    if Bp8 >= 16:
        n_tiles = max(n_tiles, min_parallel_tiles)
    TB = _round_up(pl.cdiv(Bp8, n_tiles), 8)
    grid = pl.cdiv(Bp8, TB)
    Bp = grid * TB  # tiny over-pad; every tile is full (no OOB blocks).

    x_p = x if Bp == B else jnp.zeros((Bp, din), x.dtype).at[:B].set(x)

    out_p = pl.pallas_call(
        _fused_mlp_kernel,
        out_shape=jax.ShapeDtypeStruct((Bp, output_dim), jnp.float32),
        grid=(grid,),
        in_specs=[
            # x: tiled over batch only; last dim = full extent (legal, no 128 pad).
            pl.BlockSpec((TB, din), lambda i: (i, 0)),
            # Weights/biases: full-extent blocks, constant index_map -> VMEM-resident.
            pl.BlockSpec(w1.shape, lambda i: (0, 0)),
            pl.BlockSpec(b1.shape, lambda i: (0, 0)),
            pl.BlockSpec(w2.shape, lambda i: (0, 0)),
            pl.BlockSpec(b2.shape, lambda i: (0, 0)),
            pl.BlockSpec(w3.shape, lambda i: (0, 0)),
            pl.BlockSpec(b3.shape, lambda i: (0, 0)),
        ],
        # Output written at its true width (no 128-lane padding, no wrapper slice pass).
        out_specs=pl.BlockSpec((TB, output_dim), lambda i: (i, 0)),
        compiler_params=pltpu.CompilerParams(
            dimension_semantics=("parallel",),  # batch axis -> both TCs on v7x
        ),
    )(x_p, w1, b1, w2, b2, w3, b3)

    return out_p if Bp == B else out_p[:B]


def _reference(x, params):
    ref = x
    for i, (w, b) in enumerate(params):
        ref = ref @ w + b
        if i < len(params) - 1:
            ref = jnp.maximum(ref, 0.0)
    return ref


if __name__ == "__main__":
    key = jax.random.PRNGKey(0)
    key, kx, kx2, kp = jax.random.split(key, 4)

    batch = 8
    input_dim = 16
    output_dim = 4
    hidden_layers = [64, 32]

    params = init_feedforward_params(kp, input_dim, output_dim, hidden_layers)

    # f32 path, small batch (single grid step, no padding).
    prepped_f32 = prep_params(params, jnp.float32)
    x = jax.random.normal(kx, (batch, input_dim), dtype=jnp.float32)
    out = jax.block_until_ready(feedforward_nn(x, prepped_f32))
    ref = _reference(x, params)
    assert out.shape == (batch, output_dim)
    assert jnp.allclose(out, ref, atol=1e-5, rtol=1e-5)

    # f32 path, awkward larger batch: exercises multi-tile parallel grid and the
    # minimal (few-row) batch padding.
    B2 = 1000
    x2 = jax.random.normal(kx2, (B2, input_dim), dtype=jnp.float32)
    out2 = jax.block_until_ready(feedforward_nn(x2, prepped_f32, tb=256))
    ref2 = _reference(x2, params)
    assert out2.shape == (B2, output_dim)
    assert jnp.allclose(out2, ref2, atol=1e-5, rtol=1e-5)

    # bf16 weight/activation path (f32 accumulation and bias+ReLU) with loosened
    # tolerances appropriate for bf16 mantissa.
    prepped_bf16 = prep_params(params, jnp.bfloat16)
    out3 = jax.block_until_ready(feedforward_nn(x2, prepped_bf16, tb=256))
    assert out3.shape == (B2, output_dim)
    assert jnp.allclose(out3, ref2, atol=5e-2, rtol=5e-2)

    print("KERNEL_OK")
</pallas_src>

<mosaic_0001>
module attributes {stable_mosaic.version = 11 : i64} {
  func.func @_fused_mlp_kernel(%arg0: i32, %arg1: memref<8x16xf32, #tpu.memory_space<vmem>>, %arg2: memref<16x64xf32, #tpu.memory_space<vmem>>, %arg3: memref<1x64xf32, #tpu.memory_space<vmem>>, %arg4: memref<64x32xf32, #tpu.memory_space<vmem>>, %arg5: memref<1x32xf32, #tpu.memory_space<vmem>>, %arg6: memref<32x4xf32, #tpu.memory_space<vmem>>, %arg7: memref<1x4xf32, #tpu.memory_space<vmem>>, %arg8: memref<8x4xf32, #tpu.memory_space<vmem>>) attributes {dimension_semantics = [#tpu.dimension_semantics<parallel>], iteration_bounds = array<i64: 1>, scalar_prefetch = 0 : i64, scratch_operands = 0 : i64, tpu.core_type = #tpu.core_type<tc>, window_params = [{transform_indices = @transform_0, window_bounds = array<i64: 8, 16>}, {pipeline_mode = #tpu.pipeline_mode<synchronous>, transform_indices = @transform_1, window_bounds = array<i64: 16, 64>}, {pipeline_mode = #tpu.pipeline_mode<synchronous>, transform_indices = @transform_2, window_bounds = array<i64: 1, 64>}, {pipeline_mode = #tpu.pipeline_mode<synchronous>, transform_indices = @transform_3, window_bounds = array<i64: 64, 32>}, {pipeline_mode = #tpu.pipeline_mode<synchronous>, transform_indices = @transform_4, window_bounds = array<i64: 1, 32>}, {pipeline_mode = #tpu.pipeline_mode<synchronous>, transform_indices = @transform_5, window_bounds = array<i64: 32, 4>}, {pipeline_mode = #tpu.pipeline_mode<synchronous>, transform_indices = @transform_6, window_bounds = array<i64: 1, 4>}, {transform_indices = @transform_7, window_bounds = array<i64: 8, 4>}]} {
    %c0 = arith.constant 0 : index
    %c0_0 = arith.constant 0 : index
    %0 = vector.load %arg1[%c0, %c0_0] : memref<8x16xf32, #tpu.memory_space<vmem>>, vector<8x16xf32>
    %c0_1 = arith.constant 0 : index
    %c0_2 = arith.constant 0 : index
    %1 = vector.load %arg2[%c0_1, %c0_2] : memref<16x64xf32, #tpu.memory_space<vmem>>, vector<16x64xf32>
    %cst = arith.constant dense<0.000000e+00> : vector<8x64xf32>
    %2 = tpu.matmul %0, %1, %cst {dimension_numbers = #tpu.dot_dimension_numbers<[1], [0], [0], [1], [0, 0, 1, 1], [], []>} : vector<8x16xf32>, vector<16x64xf32>, vector<8x64xf32> -> vector<8x64xf32>
    %c0_3 = arith.constant 0 : index
    %c0_4 = arith.constant 0 : index
    %3 = vector.load %arg3[%c0_3, %c0_4] : memref<1x64xf32, #tpu.memory_space<vmem>>, vector<1x64xf32>
    %4 = vector.broadcast %3 : vector<1x64xf32> to vector<8x64xf32>
    %5 = arith.addf %2, %4 : vector<8x64xf32>
    %cst_5 = arith.constant 0.000000e+00 : f32
    %6 = vector.broadcast %cst_5 : f32 to vector<8x64xf32>
    %7 = arith.maximumf %5, %6 : vector<8x64xf32>
    %c0_6 = arith.constant 0 : index
    %c0_7 = arith.constant 0 : index
    %8 = vector.load %arg4[%c0_6, %c0_7] : memref<64x32xf32, #tpu.memory_space<vmem>>, vector<64x32xf32>
    %cst_8 = arith.constant dense<0.000000e+00> : vector<8x32xf32>
    %9 = tpu.matmul %7, %8, %cst_8 {dimension_numbers = #tpu.dot_dimension_numbers<[1], [0], [0], [1], [0, 0, 1, 1], [], []>} : vector<8x64xf32>, vector<64x32xf32>, vector<8x32xf32> -> vector<8x32xf32>
    %c0_9 = arith.constant 0 : index
    %c0_10 = arith.constant 0 : index
    %10 = vector.load %arg5[%c0_9, %c0_10] : memref<1x32xf32, #tpu.memory_space<vmem>>, vector<1x32xf32>
    %11 = vector.broadcast %10 : vector<1x32xf32> to vector<8x32xf32>
    %12 = arith.addf %9, %11 : vector<8x32xf32>
    %cst_11 = arith.constant 0.000000e+00 : f32
    %13 = vector.broadcast %cst_11 : f32 to vector<8x32xf32>
    %14 = arith.maximumf %12, %13 : vector<8x32xf32>
    %c0_12 = arith.constant 0 : index
    %c0_13 = arith.constant 0 : index
    %15 = vector.load %arg6[%c0_12, %c0_13] : memref<32x4xf32, #tpu.memory_space<vmem>>, vector<32x4xf32>
    %cst_14 = arith.constant dense<0.000000e+00> : vector<8x4xf32>
    %16 = tpu.matmul %14, %15, %cst_14 {dimension_numbers = #tpu.dot_dimension_numbers<[1], [0], [0], [1], [0, 0, 1, 1], [], []>} : vector<8x32xf32>, vector<32x4xf32>, vector<8x4xf32> -> vector<8x4xf32>
    %c0_15 = arith.constant 0 : index
    %c0_16 = arith.constant 0 : index
    %17 = vector.load %arg7[%c0_15, %c0_16] : memref<1x4xf32, #tpu.memory_space<vmem>>, vector<1x4xf32>
    %18 = vector.broadcast %17 : vector<1x4xf32> to vector<8x4xf32>
    %19 = arith.addf %16, %18 : vector<8x4xf32>
    %c0_17 = arith.constant 0 : index
    %c0_18 = arith.constant 0 : index
    %20 = vector.load %arg8[%c0_17, %c0_18] : memref<8x4xf32, #tpu.memory_space<vmem>>, vector<8x4xf32>
    tpu.vector_store %arg8[%c0_17, %c0_18], %19 {strides = array<i32>} : memref<8x4xf32, #tpu.memory_space<vmem>>, vector<8x4xf32>,
    return
  }
  func.func @transform_0(%arg0: i32) -> (i32, i32) {
    %c0_i32 = arith.constant 0 : i32
    %c0_i32_0 = arith.constant 0 : i32
    return %arg0, %c0_i32 : i32, i32
  }
  func.func @transform_1(%arg0: i32) -> (i32, i32) {
    %c0_i32 = arith.constant 0 : i32
    %c0_i32_0 = arith.constant 0 : i32
    %c0_i32_1 = arith.constant 0 : i32
    return %c0_i32, %c0_i32_0 : i32, i32
  }
  func.func @transform_2(%arg0: i32) -> (i32, i32) {
    %c0_i32 = arith.constant 0 : i32
    %c0_i32_0 = arith.constant 0 : i32
    %c0_i32_1 = arith.constant 0 : i32
    return %c0_i32, %c0_i32_0 : i32, i32
  }
  func.func @transform_3(%arg0: i32) -> (i32, i32) {
    %c0_i32 = arith.constant 0 : i32
    %c0_i32_0 = arith.constant 0 : i32
    %c0_i32_1 = arith.constant 0 : i32
    return %c0_i32, %c0_i32_0 : i32, i32
  }
  func.func @transform_4(%arg0: i32) -> (i32, i32) {
    %c0_i32 = arith.constant 0 : i32
    %c0_i32_0 = arith.constant 0 : i32
    %c0_i32_1 = arith.constant 0 : i32
    return %c0_i32, %c0_i32_0 : i32, i32
  }
  func.func @transform_5(%arg0: i32) -> (i32, i32) {
    %c0_i32 = arith.constant 0 : i32
    %c0_i32_0 = arith.constant 0 : i32
    %c0_i32_1 = arith.constant 0 : i32
    return %c0_i32, %c0_i32_0 : i32, i32
  }
  func.func @transform_6(%arg0: i32) -> (i32, i32) {
    %c0_i32 = arith.constant 0 : i32
    %c0_i32_0 = arith.constant 0 : i32
    %c0_i32_1 = arith.constant 0 : i32
    return %c0_i32, %c0_i32_0 : i32, i32
  }
  func.func @transform_7(%arg0: i32) -> (i32, i32) {
    %c0_i32 = arith.constant 0 : i32
    %c0_i32_0 = arith.constant 0 : i32
    return %arg0, %c0_i32 : i32, i32
  }
}

</mosaic_0001>

<bundles_post_ra>
// kernel: tpu_custom_call.1
= control target key start
LH: loop header
LB: loop body
LE: loop exit
PB: predicated region body
PF: predicated region fallthrough
CT: control target
= control target key end

     0   :  { %v376_v0 = vmov 0.0|0.0   ;;  %vm377_vm0 = vmmov 0   ;;  %v378_v3 = vmov 0.0   ;;  %vm36_vm1 = vcmask 130048   ;;  %s479_s1 = inlined_call_operand.vmem [shape: f32[16,64], index: 1, kind: input, shape index: {}]   ;;  %s480_s3 = inlined_call_operand.vmem [shape: f32[64,32], index: 3, kind: input, shape index: {}]   ;;  %s481_s0 = inlined_call_operand.vmem [shape: f32[8,16], index: 0, kind: input, shape index: {}]   ;;  %s482_s5 = inlined_call_operand.vmem [shape: f32[32,4], index: 5, kind: input, shape index: {}]   ;;  %s483_s2 = inlined_call_operand.vmem [shape: f32[1,64], index: 2, kind: input, shape index: {}]   ;;  %s484_s4 = inlined_call_operand.vmem [shape: f32[1,32], index: 4, kind: input, shape index: {}]   ;;  %s485_s6 = inlined_call_operand.vmem [shape: f32[1,4], index: 6, kind: input, shape index: {}]   ;;  %s486_s7 = inlined_call_operand.vmem [shape: f32[8,4], index: 7, kind: output, shape index: {}]  }
   0x1   :  { %352 = vmatprep.subr.bf16.mxu0 %v376_v0  ;;  %v27_v1 = vld [vmem:[%s479_s1] sm:$0xff]  ;;  %v28_v2 = vld [vmem:[%s479_s1 + $0x8] sm:$0xff]  ;;  %319 = vmatprep.mubr.msk.f32.mxu0 %vm377_vm0, %v378_v3  ;;  %v113_v7 = vld [vmem:[%s480_s3 + $0x10] sm:$0xff]  ;;  %vm126_vm2 = vcmask 523264   ;;  %vm212_vm3 = vcmask 261120   ;;  %vm286_vm4 = vcmask 31744  }
   0x2   :  { %v353_v4 = vpack.c.bf16 %v28_v2, %v27_v1  ;;  %355 = vmatprep.subr.bf16.mxu1 %v376_v0  ;;  %v111_v5 = vld [vmem:[%s480_s3] sm:$0xff]  ;;  %v112_v6 = vld [vmem:[%s480_s3 + $0x8] sm:$0xff]  ;;  %338 = vmatprep.mubr.msk.f32.mxu1 %vm377_vm0, %v378_v3  ;;  %v114_v9 = vld [vmem:[%s480_s3 + $0x18] sm:$0xff] }
   0x3   :  { %v356_v8 = vpack.c.bf16 %v112_v6, %v111_v5  ;;  %v26_v10 = vld [vmem:[%s481_s0] sm:$0xff]  ;;  %v359_v11 = vpack.c.bf16 %v114_v9, %v113_v7  ;;  %v116_v13 = vld [vmem:[%s480_s3 + $0x28] sm:$0xff]  ;;  %v117_v15 = vld [vmem:[%s480_s3 + $0x30] sm:$0xff] }
   0x4   :  { %354 = vmatpush3.bf16.msra.mxu0 %v353_v4  ;;  %v115_v12 = vld [vmem:[%s480_s3 + $0x20] sm:$0xff]  ;;  %v118_v16 = vld [vmem:[%s480_s3 + $0x38] sm:$0xff]  ;;  %v202_v19 = vld [vmem:[%s482_s5 + $0x8] sm:$0xff] }
   0x5   :  { %357 = vmatpush3.bf16.msra.mxu1 %v356_v8  ;;  %367 = vmatprep.subr.bf16.mxu0 %v376_v0  ;;  %v362_v14 = vpack.c.bf16 %v116_v13, %v115_v12  ;;  %v365_v17 = vpack.c.bf16 %v118_v16, %v117_v15  ;;  %v201_v18 = vld [vmem:[%s482_s5] sm:$0xff]  ;;  %v203_v26 = vld [vmem:[%s482_s5 + $0x10] sm:$0xff]  ;;  %v204_v27 = vld [vmem:[%s482_s5 + $0x18] sm:$0xff] }
   0x6   :  { %358 = vmatprep.subr.bf16.mxu1 %v376_v0  ;;  %v368_v20 = vpack.c.bf16 %v202_v19, %v201_v18  ;;  %v292_v21 = vld [vmem:[%s483_s2] ss:$0 sm:$0xff]  ;;  %v371_v28 = vpack.c.bf16 %v204_v27, %v203_v26 }
   0x7   :  { %320 = vmatmul.mubr.msk.f32.vlgmr.msra.gmra.mrb[0].mxu0 %vm36_vm1, %v26_v10  ;;  %v294_v29 = vld [vmem:[%s484_s4] ss:$0 sm:$0xff] }
   0x8   :  { %349 = vmatprep.mubr.msk.f32.mxu0 %vm377_vm0, %v378_v3  ;;  %369 = vmatpush3.bf16.msra.mxu0 %v368_v20  ;;  %v296_v34 = vld [vmem:[%s485_s6] ss:$0 sm:$0xff] }
   0x9   :  { %360 = vmatpush3.bf16.msra.mxu1 %v359_v11  ;;  %370 = vmatprep.subr.bf16.mxu0 %v376_v0 }
   0xa   :  { %361 = vmatprep.subr.bf16.mxu1 %v376_v0 }
   0xc   :  { %372 = vmatpush3.bf16.msra.mxu0 %v371_v28 }
   0xd   :  { %363 = vmatpush3.bf16.msra.mxu1 %v362_v14 }
   0xe   :  { %364 = vmatprep.subr.bf16.mxu1 %v376_v0 }
  0x11   :  { %366 = vmatpush3.bf16.msra.mxu1 %v365_v17 }
  0xda   :  { %v106_v22 = vpop.f32.mrb[0].mxu0 }
  0xdb   :  { %v107_v23 = vadd.f32 %v292_v21, %v106_v22  ;;  %v321_v24 = vpop.f32.mrb[1].mxu0 }
  0xdd   :  { %v110_v25 = vmax.f32 %v107_v23, 0.0 }
  0xdf   :  { %339 = vmatmul.mubr.msk.f32.vlgmr.msra.gmra.mrb[0].mxu1 %vm126_vm2, %v110_v25 }
 0x1b2   :  { %v196_v30 = vpop.f32.mrb[0].mxu1 }
 0x1b3   :  { %v197_v31 = vadd.f32 %v294_v29, %v196_v30  ;;  %v340_v32 = vpop.f32.mrb[1].mxu1 }
 0x1b5   :  { %v200_v33 = vmax.f32 %v197_v31, 0.0 }
 0x1b7   :  { %350 = vmatmul.mubr.msk.f32.vlgmr.msra.gmra.mrb[2].mxu0 %vm212_vm3, %v200_v33 }
 0x28a   :  { %v282_v35 = vpop.f32.mrb[2].mxu0 }
 0x28b   :  { %v283_v36 = vadd.f32 %v296_v34, %v282_v35  ;;  %v351_v37 = vpop.f32.mrb[3].mxu0 }
 0x28d   :  { %287 = vst.msk [vmem:[%s486_s7] sm:$0xff] %vm286_vm4, %v283_v36 }

</bundles_post_ra>
